<compile_context>
chip_gen: v7x
topology: tpu7x:2x2x1
jax: 0.10.0
libtpu: 0.0.40
codegen_flags: <defaults>
</compile_context>

<pallas_src>
import jax
import jax.numpy as jnp
import numpy as np
from jax import lax
from jax.experimental import pallas as pl
from jax.experimental.pallas import tpu as pltpu


def _round_up(x, m):
    return ((x + m - 1) // m) * m


def _pad_to(x, target_shape):
    pads = [(0, t - s) for s, t in zip(x.shape, target_shape)]
    if any(p[1] for p in pads):
        x = jnp.pad(x, pads)
    return x


def _physical_vmem_bytes():
    """Per-core physical VMEM, with a conservative (v7x) fallback."""
    try:
        info = pltpu.get_tpu_info()
        for attr in ("vmem_capacity_bytes", "vmem_size_bytes", "vmem_bytes"):
            v = getattr(info, attr, None)
            if v:
                return int(v)
    except Exception:
        pass
    return 64 << 20


_S_CHUNK = 8              # sublane granularity of the in-kernel masked-sum loop
_H_BUF_BUDGET = 2 << 20   # target bytes per pipelined (hidden + mask) buffer


def _vbll_retriever_kernel(h_ref, m_ref, wmean_t_ref, wvar_t_ref, nvar_ref,
                           mean_ref, var_ref, acc_ref):
    s_id = pl.program_id(1)

    @pl.when(s_id == 0)
    def _():
        acc_ref[...] = jnp.zeros_like(acc_ref)

    # --- cls_pooling partial: (mask/denom)-weighted sum over this seq tile ---
    # Chunked over small sublane groups so the live elementwise temporary stays
    # at [B_TILE, _S_CHUNK, D] (a few vregs) instead of a full-tile f32 blowup.
    s_tile = h_ref.shape[1]
    n_chunks = s_tile // _S_CHUNK
    rem = s_tile % _S_CHUNK

    def _accum(start, size):
        h = h_ref[:, pl.ds(start, size), :].astype(jnp.float32)
        m = m_ref[:, pl.ds(start, size), :]                  # [Bt, size, 1] f32
        acc_ref[...] += jnp.sum(h * m, axis=1)

    if 0 < n_chunks <= 8:
        for c in range(n_chunks):                            # short: fully unrolled
            _accum(c * _S_CHUNK, _S_CHUNK)
    elif n_chunks > 8:
        def body(c, carry):
            _accum(pl.multiple_of(c * _S_CHUNK, _S_CHUNK), _S_CHUNK)
            return carry
        lax.fori_loop(0, n_chunks, body, 0)
    if rem > 0:
        _accum(n_chunks * _S_CHUNK, rem)

    # --- finalize on last sequence step: VBLL (diag) predictive on the MXU ---
    @pl.when(s_id == pl.num_programs(1) - 1)
    def _():
        emb = acc_ref[...]              # masked mean (1/denom folded into mask)
        mean_ref[...] = jnp.dot(emb, wmean_t_ref[...],
                                preferred_element_type=jnp.float32)
        var_ref[...] = jnp.dot(emb * emb, wvar_t_ref[...],
                               preferred_element_type=jnp.float32) + nvar_ref[...]


def _choose_tiles(B, S, D, h_itemsize):
    """Pick (B_TILE, S_TILE, B_pad, S_pad) honoring the VMEM buffer budget and
    avoiding input padding whenever possible."""
    d_lanes = _round_up(D, 128)     # VMEM lane footprint of the hidden dim

    def row_cost(bt):
        # VMEM bytes one sequence position costs per batch tile:
        # hidden row (native dtype) + f32 mask row (1-lane block pads to 128).
        return bt * (d_lanes * h_itemsize + 128 * 4)

    # Batch tile: single full-batch tile for tiny B, otherwise >= 2 tiles so
    # the "parallel" batch axis shards across both v7x TensorCores; shrink
    # until at least 8 sequence rows fit the per-buffer budget.
    if B <= 8:
        B_TILE, B_pad = B, B
    else:
        B_TILE = min(128, _round_up(-(-B // 2), 8))
        while B_TILE > 8 and row_cost(B_TILE) * 8 > _H_BUF_BUDGET:
            B_TILE = max(8, _round_up(B_TILE // 2, 8))
        B_pad = _round_up(B, B_TILE)
    # TODO(synk): sweep B_TILE=256 for B >= 512 on v6e/v7x once VMEM allows.

    # Sequence tile: as many rows as the budget allows (no 128-row floor);
    # prefer the full sequence or a multiple-of-8 divisor of S (no padding).
    max_rows = max(_S_CHUNK, _H_BUF_BUDGET // max(1, row_cost(B_TILE)))
    if S <= max_rows:
        S_TILE, S_pad = S, S
    else:
        S_TILE = None
        if S % 8 == 0:
            for cand in range(8, (max_rows // 8) * 8 + 1, 8):
                if S % cand == 0:
                    S_TILE = cand                 # largest divisor within budget
        if S_TILE is None:
            S_TILE = max(8, (max_rows // 8) * 8)
        S_pad = _round_up(S, S_TILE)
    return B_TILE, S_TILE, B_pad, S_pad


def _make_pallas_call(B_pad, S_pad, D, B_TILE, S_TILE, vmem_limit, cost,
                      single_buffer_weights):
    wkw = dict(pipeline_mode=pl.Buffered(1)) if single_buffer_weights else {}
    grid = (B_pad // B_TILE, S_pad // S_TILE)
    return pl.pallas_call(
        _vbll_retriever_kernel,
        out_shape=(jax.ShapeDtypeStruct((B_pad, D), jnp.float32),
                   jax.ShapeDtypeStruct((B_pad, D), jnp.float32)),
        grid_spec=pltpu.PrefetchScalarGridSpec(
            num_scalar_prefetch=0,
            grid=grid,
            in_specs=[
                # streaming hidden-state tile (native dtype, no D padding)
                pl.BlockSpec((B_TILE, S_TILE, D), lambda b, s: (b, s, 0)),
                # pre-scaled f32 mask tile (mask * 1/denom), seq on sublanes
                pl.BlockSpec((B_TILE, S_TILE, 1), lambda b, s: (b, s, 0)),
                # grid-invariant weight slabs: DMA'd once, VMEM-resident
                pl.BlockSpec((D, D), lambda b, s: (0, 0), **wkw),     # W_mean^T
                pl.BlockSpec((D, D), lambda b, s: (0, 0), **wkw),     # exp(2*W_logdiag)^T
                pl.BlockSpec((1, D), lambda b, s: (0, 0), **wkw),     # noise variance row
            ],
            out_specs=[
                pl.BlockSpec((B_TILE, D), lambda b, s: (b, 0)),
                pl.BlockSpec((B_TILE, D), lambda b, s: (b, 0)),
            ],
            scratch_shapes=[pltpu.VMEM((B_TILE, D), jnp.float32)],
        ),
        compiler_params=pltpu.CompilerParams(
            dimension_semantics=("parallel", "arbitrary"),
            vmem_limit_bytes=vmem_limit),
        cost_estimate=cost,
        # TODO(synk): sweep pipeline_mode=pl.Buffered(3) on the hidden-state
        # spec once per-step tiles are small (exposed-DMA hiding, ~0-10%).
    )


def vbll_retriever_forward(last_hidden_state, attention_mask,
                           W_mean, W_logdiag, noise_logdiag):
    """Fused cls_pooling + vbll.Regression (diagonal) predictive distribution.

    Returns (pred_mean, pred_var)."""
    B, S, D = last_hidden_state.shape
    h_itemsize = jnp.dtype(last_hidden_state.dtype).itemsize
    B_TILE, S_TILE, B_pad, S_pad = _choose_tiles(B, S, D, h_itemsize)

    # --- parameter / scalar prep hoisted out of the hot kernel ---
    wmean_t = W_mean.astype(jnp.float32).T                       # [D, D]
    wvar_t = jnp.exp(2.0 * W_logdiag.astype(jnp.float32)).T      # [D, D]
    nvar = jnp.exp(2.0 * noise_logdiag.astype(jnp.float32)).reshape(1, D)

    # Fold 1/clamp(sum(mask),1e-9) into the mask so the accumulator holds the
    # masked mean directly (one fewer input DMA, shorter finalize tail).
    mask_f = attention_mask.astype(jnp.float32)
    inv_denom = 1.0 / jnp.clip(mask_f.sum(axis=1, keepdims=True), 1e-9, None)
    mask_scaled = mask_f * inv_denom                             # [B, S]

    # Pad only when strictly necessary (tile chooser prefers exact divisors;
    # D is never padded -- full-extent lane blocks are used instead).
    h = _pad_to(last_hidden_state, (B_pad, S_pad, D))
    mask3d = _pad_to(mask_scaled, (B_pad, S_pad))[:, :, None]    # [B_pad, S_pad, 1]

    # --- VMEM estimate (double-buffered streams, worst-case weight buffers) ---
    d_lanes = _round_up(D, 128)
    est_vmem = (2 * B_TILE * S_TILE * d_lanes * h_itemsize            # h tiles
                + 2 * B_TILE * _round_up(S_TILE, 8) * 128 * 4         # mask tiles
                + 2 * (2 * d_lanes + 8) * d_lanes * 4                 # weight slabs + noise row
                + 4 * B_TILE * d_lanes * 4                            # two outputs, double-buffered
                + B_TILE * d_lanes * 4                                # accumulator scratch
                + (2 << 20))                                          # compiler scratch slack
    cap = max(_physical_vmem_bytes() - (8 << 20), 16 << 20)           # per-generation cap
    vmem_limit = int(min(cap, max(2 * est_vmem, 16 << 20)))

    cost = pl.CostEstimate(
        flops=4 * B * D * D + 3 * B * S * D,
        transcendentals=0,
        bytes_accessed=(B * S * D * h_itemsize + B * S * 4
                        + 2 * D * D * 4 + D * 4 + 2 * B * D * 4),
    )

    args = (h, mask3d, wmean_t, wvar_t, nvar)
    try:
        # Single-buffer the grid-invariant weight slabs (pl.Buffered(1)).
        mean_p, var_p = _make_pallas_call(B_pad, S_pad, D, B_TILE, S_TILE,
                                          vmem_limit, cost, True)(*args)
    except Exception:
        # Fallback if pipeline_mode/Buffered(1) is unsupported in this jax
        # version: default double buffering (est_vmem already assumed it).
        mean_p, var_p = _make_pallas_call(B_pad, S_pad, D, B_TILE, S_TILE,
                                          vmem_limit, cost, False)(*args)
    return mean_p[:B], var_p[:B]


def synthetic_backbone(input_ids, emb_table, proj_w, proj_b):
    # TODO(synk): stand-in for the frozen HF backbone; plain-JAX glue.
    h = emb_table[input_ids]                              # [B, S, D]
    return jnp.tanh(h @ proj_w + proj_b)                  # [B, S, D]


if __name__ == "__main__":
    B, S, D, V = 2, 8, 32, 100                            # batch, seq, hidden, vocab
    wishart_scale = 0.1

    key = jax.random.PRNGKey(0)
    k = jax.random.split(key, 6)

    # Inputs (what the tokenizer would produce).
    input_ids = jax.random.randint(k[0], (B, S), 0, V, dtype=jnp.int32)
    attention_mask = jnp.ones((B, S), jnp.int32).at[1, 5:].set(0)  # ragged batch

    # Frozen synthetic-backbone parameters.
    emb_table = 0.02 * jax.random.normal(k[1], (V, D), jnp.float32)
    proj_w = 0.1 * jax.random.normal(k[2], (D, D), jnp.float32)
    proj_b = jnp.zeros((D,), jnp.float32)

    # vbll.Regression(dim, dim, ...) parameters, diagonal parameterization.
    W_mean = jax.random.normal(k[3], (D, D), jnp.float32)                       # [out, in]
    W_logdiag = jax.random.normal(k[4], (D, D), jnp.float32) - 0.5 * np.log(D)  # [out, in]
    noise_logdiag = jax.random.normal(k[5], (D,), jnp.float32) * np.log(wishart_scale)

    # Forward.
    last_hidden_state = synthetic_backbone(input_ids, emb_table, proj_w, proj_b)
    pred_mean, pred_var = vbll_retriever_forward(
        last_hidden_state, attention_mask, W_mean, W_logdiag, noise_logdiag)
    jax.block_until_ready((pred_mean, pred_var))

    # Plain-JAX reference check (same semantics as the PyTorch module).
    me = attention_mask.astype(jnp.float32)[:, :, None]
    emb_ref = (last_hidden_state * me).sum(1) / jnp.maximum(me.sum(1), 1e-9)
    ref_mean = emb_ref @ W_mean.T
    ref_var = (emb_ref ** 2) @ jnp.exp(2.0 * W_logdiag).T + jnp.exp(2.0 * noise_logdiag)[None, :]
    assert np.allclose(np.asarray(pred_mean), np.asarray(ref_mean), atol=1e-4, rtol=1e-4)
    assert np.allclose(np.asarray(pred_var), np.asarray(ref_var), atol=1e-4, rtol=1e-4)

    print("KERNEL_OK")
</pallas_src>

<mosaic_0001>
module attributes {stable_mosaic.version = 11 : i64} {
  func.func @_vbll_retriever_kernel(%arg0: i32, %arg1: i32, %arg2: memref<2x8x32xf32, #tpu.memory_space<vmem>>, %arg3: memref<2x8x1xf32, #tpu.memory_space<vmem>>, %arg4: memref<32x32xf32, #tpu.memory_space<vmem>>, %arg5: memref<32x32xf32, #tpu.memory_space<vmem>>, %arg6: memref<1x32xf32, #tpu.memory_space<vmem>>, %arg7: memref<2x32xf32, #tpu.memory_space<vmem>>, %arg8: memref<2x32xf32, #tpu.memory_space<vmem>>, %arg9: memref<2x32xf32, #tpu.memory_space<vmem>>) attributes {dimension_semantics = [#tpu.dimension_semantics<parallel>, #tpu.dimension_semantics<arbitrary>], iteration_bounds = array<i64: 1, 1>, scalar_prefetch = 0 : i64, scratch_operands = 1 : i64, tpu.core_type = #tpu.core_type<tc>, window_params = [{transform_indices = @transform_0, window_bounds = array<i64: 2, 8, 32>}, {transform_indices = @transform_1, window_bounds = array<i64: 2, 8, 1>}, {pipeline_mode = #tpu.pipeline_mode<synchronous>, transform_indices = @transform_2, window_bounds = array<i64: 32, 32>}, {pipeline_mode = #tpu.pipeline_mode<synchronous>, transform_indices = @transform_3, window_bounds = array<i64: 32, 32>}, {pipeline_mode = #tpu.pipeline_mode<synchronous>, transform_indices = @transform_4, window_bounds = array<i64: 1, 32>}, {transform_indices = @transform_5, window_bounds = array<i64: 2, 32>}, {transform_indices = @transform_6, window_bounds = array<i64: 2, 32>}]} {
    %c0_i32 = arith.constant 0 : i32
    %0 = arith.cmpi eq, %arg1, %c0_i32 : i32
    %1 = arith.extui %0 : i1 to i32
    %c0_i32_0 = arith.constant 0 : i32
    %2 = arith.cmpi ne, %1, %c0_i32_0 : i32
    scf.if %2 {
      %cst_12 = arith.constant 0.000000e+00 : f32
      %14 = vector.broadcast %cst_12 : f32 to vector<2x32xf32>
      %c0_13 = arith.constant 0 : index
      %c0_14 = arith.constant 0 : index
      %15 = vector.load %arg9[%c0_13, %c0_14] : memref<2x32xf32, #tpu.memory_space<vmem>>, vector<2x32xf32>
      tpu.vector_store %arg9[%c0_13, %c0_14], %14 {strides = array<i32>} : memref<2x32xf32, #tpu.memory_space<vmem>>, vector<2x32xf32>,
    } else {
    }
    %c0 = arith.constant 0 : index
    %c0_1 = arith.constant 0 : index
    %c0_2 = arith.constant 0 : index
    %3 = vector.load %arg2[%c0, %c0_1, %c0_2] : memref<2x8x32xf32, #tpu.memory_space<vmem>>, vector<2x8x32xf32>
    %c0_3 = arith.constant 0 : index
    %c0_4 = arith.constant 0 : index
    %c0_5 = arith.constant 0 : index
    %4 = vector.load %arg3[%c0_3, %c0_4, %c0_5] : memref<2x8x1xf32, #tpu.memory_space<vmem>>, vector<2x8x1xf32>
    %c0_6 = arith.constant 0 : index
    %c0_7 = arith.constant 0 : index
    %5 = vector.load %arg9[%c0_6, %c0_7] : memref<2x32xf32, #tpu.memory_space<vmem>>, vector<2x32xf32>
    %6 = vector.broadcast %4 : vector<2x8x1xf32> to vector<2x8x32xf32>
    %7 = arith.mulf %3, %6 : vector<2x8x32xf32>
    %cst = arith.constant dense<0.000000e+00> : vector<2x32xf32>
    %8 = vector.multi_reduction <add>, %7, %cst [1] : vector<2x8x32xf32> to vector<2x32xf32>
    %9 = arith.addf %5, %8 : vector<2x32xf32>
    %c0_8 = arith.constant 0 : index
    %c0_9 = arith.constant 0 : index
    %10 = vector.load %arg9[%c0_8, %c0_9] : memref<2x32xf32, #tpu.memory_space<vmem>>, vector<2x32xf32>
    tpu.vector_store %arg9[%c0_8, %c0_9], %9 {strides = array<i32>} : memref<2x32xf32, #tpu.memory_space<vmem>>, vector<2x32xf32>,
    %c0_i32_10 = arith.constant 0 : i32
    %11 = arith.cmpi eq, %arg1, %c0_i32_10 : i32
    %12 = arith.extui %11 : i1 to i32
    %c0_i32_11 = arith.constant 0 : i32
    %13 = arith.cmpi ne, %12, %c0_i32_11 : i32
    scf.if %13 {
      %c0_12 = arith.constant 0 : index
      %c0_13 = arith.constant 0 : index
      %14 = vector.load %arg9[%c0_12, %c0_13] : memref<2x32xf32, #tpu.memory_space<vmem>>, vector<2x32xf32>
      %c0_14 = arith.constant 0 : index
      %c0_15 = arith.constant 0 : index
      %15 = vector.load %arg4[%c0_14, %c0_15] : memref<32x32xf32, #tpu.memory_space<vmem>>, vector<32x32xf32>
      %cst_16 = arith.constant dense<0.000000e+00> : vector<2x32xf32>
      %16 = tpu.matmul %14, %15, %cst_16 {dimension_numbers = #tpu.dot_dimension_numbers<[1], [0], [0], [1], [0, 0, 1, 1], [], []>} : vector<2x32xf32>, vector<32x32xf32>, vector<2x32xf32> -> vector<2x32xf32>
      %c0_17 = arith.constant 0 : index
      %c0_18 = arith.constant 0 : index
      %17 = vector.load %arg7[%c0_17, %c0_18] : memref<2x32xf32, #tpu.memory_space<vmem>>, vector<2x32xf32>
      tpu.vector_store %arg7[%c0_17, %c0_18], %16 {strides = array<i32>} : memref<2x32xf32, #tpu.memory_space<vmem>>, vector<2x32xf32>,
      %18 = arith.mulf %14, %14 : vector<2x32xf32>
      %c0_19 = arith.constant 0 : index
      %c0_20 = arith.constant 0 : index
      %19 = vector.load %arg5[%c0_19, %c0_20] : memref<32x32xf32, #tpu.memory_space<vmem>>, vector<32x32xf32>
      %cst_21 = arith.constant dense<0.000000e+00> : vector<2x32xf32>
      %20 = tpu.matmul %18, %19, %cst_21 {dimension_numbers = #tpu.dot_dimension_numbers<[1], [0], [0], [1], [0, 0, 1, 1], [], []>} : vector<2x32xf32>, vector<32x32xf32>, vector<2x32xf32> -> vector<2x32xf32>
      %c0_22 = arith.constant 0 : index
      %c0_23 = arith.constant 0 : index
      %21 = vector.load %arg6[%c0_22, %c0_23] : memref<1x32xf32, #tpu.memory_space<vmem>>, vector<1x32xf32>
      %22 = vector.broadcast %21 : vector<1x32xf32> to vector<2x32xf32>
      %23 = arith.addf %20, %22 : vector<2x32xf32>
      %c0_24 = arith.constant 0 : index
      %c0_25 = arith.constant 0 : index
      %24 = vector.load %arg8[%c0_24, %c0_25] : memref<2x32xf32, #tpu.memory_space<vmem>>, vector<2x32xf32>
      tpu.vector_store %arg8[%c0_24, %c0_25], %23 {strides = array<i32>} : memref<2x32xf32, #tpu.memory_space<vmem>>, vector<2x32xf32>,
    } else {
    }
    return
  }
  func.func @transform_0(%arg0: i32, %arg1: i32) -> (i32, i32, i32) {
    %c0_i32 = arith.constant 0 : i32
    %c0_i32_0 = arith.constant 0 : i32
    return %arg0, %arg1, %c0_i32 : i32, i32, i32
  }
  func.func @transform_1(%arg0: i32, %arg1: i32) -> (i32, i32, i32) {
    %c0_i32 = arith.constant 0 : i32
    %c0_i32_0 = arith.constant 0 : i32
    return %arg0, %arg1, %c0_i32 : i32, i32, i32
  }
  func.func @transform_2(%arg0: i32, %arg1: i32) -> (i32, i32) {
    %c0_i32 = arith.constant 0 : i32
    %c0_i32_0 = arith.constant 0 : i32
    %c0_i32_1 = arith.constant 0 : i32
    return %c0_i32, %c0_i32_0 : i32, i32
  }
  func.func @transform_3(%arg0: i32, %arg1: i32) -> (i32, i32) {
    %c0_i32 = arith.constant 0 : i32
    %c0_i32_0 = arith.constant 0 : i32
    %c0_i32_1 = arith.constant 0 : i32
    return %c0_i32, %c0_i32_0 : i32, i32
  }
  func.func @transform_4(%arg0: i32, %arg1: i32) -> (i32, i32) {
    %c0_i32 = arith.constant 0 : i32
    %c0_i32_0 = arith.constant 0 : i32
    %c0_i32_1 = arith.constant 0 : i32
    return %c0_i32, %c0_i32_0 : i32, i32
  }
  func.func @transform_5(%arg0: i32, %arg1: i32) -> (i32, i32) {
    %c0_i32 = arith.constant 0 : i32
    %c0_i32_0 = arith.constant 0 : i32
    return %arg0, %c0_i32 : i32, i32
  }
  func.func @transform_6(%arg0: i32, %arg1: i32) -> (i32, i32) {
    %c0_i32 = arith.constant 0 : i32
    %c0_i32_0 = arith.constant 0 : i32
    return %arg0, %c0_i32 : i32, i32
  }
}

module attributes {stable_mosaic.version = 11 : i64} {
  func.func @_vbll_retriever_kernel(%arg0: i32, %arg1: i32, %arg2: memref<2x8x32xf32, #tpu.memory_space<vmem>>, %arg3: memref<2x8x1xf32, #tpu.memory_space<vmem>>, %arg4: memref<32x32xf32, #tpu.memory_space<vmem>>, %arg5: memref<32x32xf32, #tpu.memory_space<vmem>>, %arg6: memref<1x32xf32, #tpu.memory_space<vmem>>, %arg7: memref<2x32xf32, #tpu.memory_space<vmem>>, %arg8: memref<2x32xf32, #tpu.memory_space<vmem>>, %arg9: memref<2x32xf32, #tpu.memory_space<vmem>>) attributes {dimension_semantics = [#tpu.dimension_semantics<parallel>, #tpu.dimension_semantics<arbitrary>], iteration_bounds = array<i64: 1, 1>, scalar_prefetch = 0 : i64, scratch_operands = 1 : i64, tpu.core_type = #tpu.core_type<tc>, window_params = [{transform_indices = @transform_0, window_bounds = array<i64: 2, 8, 32>}, {transform_indices = @transform_1, window_bounds = array<i64: 2, 8, 1>}, {pipeline_mode = #tpu.pipeline_mode<synchronous>, transform_indices = @transform_2, window_bounds = array<i64: 32, 32>}, {pipeline_mode = #tpu.pipeline_mode<synchronous>, transform_indices = @transform_3, window_bounds = array<i64: 32, 32>}, {pipeline_mode = #tpu.pipeline_mode<synchronous>, transform_indices = @transform_4, window_bounds = array<i64: 1, 32>}, {transform_indices = @transform_5, window_bounds = array<i64: 2, 32>}, {transform_indices = @transform_6, window_bounds = array<i64: 2, 32>}]} {
    %c0_i32 = arith.constant 0 : i32
    %0 = arith.cmpi eq, %arg1, %c0_i32 : i32
    %1 = arith.extui %0 : i1 to i32
    %c0_i32_0 = arith.constant 0 : i32
    %2 = arith.cmpi ne, %1, %c0_i32_0 : i32
    scf.if %2 {
      %cst_12 = arith.constant 0.000000e+00 : f32
      %14 = vector.broadcast %cst_12 : f32 to vector<2x32xf32>
      %c0_13 = arith.constant 0 : index
      %c0_14 = arith.constant 0 : index
      %15 = vector.load %arg9[%c0_13, %c0_14] : memref<2x32xf32, #tpu.memory_space<vmem>>, vector<2x32xf32>
      tpu.vector_store %arg9[%c0_13, %c0_14], %14 {strides = array<i32>} : memref<2x32xf32, #tpu.memory_space<vmem>>, vector<2x32xf32>,
    } else {
    }
    %c0 = arith.constant 0 : index
    %c0_1 = arith.constant 0 : index
    %c0_2 = arith.constant 0 : index
    %3 = vector.load %arg2[%c0, %c0_1, %c0_2] : memref<2x8x32xf32, #tpu.memory_space<vmem>>, vector<2x8x32xf32>
    %c0_3 = arith.constant 0 : index
    %c0_4 = arith.constant 0 : index
    %c0_5 = arith.constant 0 : index
    %4 = vector.load %arg3[%c0_3, %c0_4, %c0_5] : memref<2x8x1xf32, #tpu.memory_space<vmem>>, vector<2x8x1xf32>
    %c0_6 = arith.constant 0 : index
    %c0_7 = arith.constant 0 : index
    %5 = vector.load %arg9[%c0_6, %c0_7] : memref<2x32xf32, #tpu.memory_space<vmem>>, vector<2x32xf32>
    %6 = vector.broadcast %4 : vector<2x8x1xf32> to vector<2x8x32xf32>
    %7 = arith.mulf %3, %6 : vector<2x8x32xf32>
    %cst = arith.constant dense<0.000000e+00> : vector<2x32xf32>
    %8 = vector.multi_reduction <add>, %7, %cst [1] : vector<2x8x32xf32> to vector<2x32xf32>
    %9 = arith.addf %5, %8 : vector<2x32xf32>
    %c0_8 = arith.constant 0 : index
    %c0_9 = arith.constant 0 : index
    %10 = vector.load %arg9[%c0_8, %c0_9] : memref<2x32xf32, #tpu.memory_space<vmem>>, vector<2x32xf32>
    tpu.vector_store %arg9[%c0_8, %c0_9], %9 {strides = array<i32>} : memref<2x32xf32, #tpu.memory_space<vmem>>, vector<2x32xf32>,
    %c0_i32_10 = arith.constant 0 : i32
    %11 = arith.cmpi eq, %arg1, %c0_i32_10 : i32
    %12 = arith.extui %11 : i1 to i32
    %c0_i32_11 = arith.constant 0 : i32
    %13 = arith.cmpi ne, %12, %c0_i32_11 : i32
    scf.if %13 {
      %c0_12 = arith.constant 0 : index
      %c0_13 = arith.constant 0 : index
      %14 = vector.load %arg9[%c0_12, %c0_13] : memref<2x32xf32, #tpu.memory_space<vmem>>, vector<2x32xf32>
      %c0_14 = arith.constant 0 : index
      %c0_15 = arith.constant 0 : index
      %15 = vector.load %arg4[%c0_14, %c0_15] : memref<32x32xf32, #tpu.memory_space<vmem>>, vector<32x32xf32>
      %cst_16 = arith.constant dense<0.000000e+00> : vector<2x32xf32>
      %16 = tpu.matmul %14, %15, %cst_16 {dimension_numbers = #tpu.dot_dimension_numbers<[1], [0], [0], [1], [0, 0, 1, 1], [], []>} : vector<2x32xf32>, vector<32x32xf32>, vector<2x32xf32> -> vector<2x32xf32>
      %c0_17 = arith.constant 0 : index
      %c0_18 = arith.constant 0 : index
      %17 = vector.load %arg7[%c0_17, %c0_18] : memref<2x32xf32, #tpu.memory_space<vmem>>, vector<2x32xf32>
      tpu.vector_store %arg7[%c0_17, %c0_18], %16 {strides = array<i32>} : memref<2x32xf32, #tpu.memory_space<vmem>>, vector<2x32xf32>,
      %18 = arith.mulf %14, %14 : vector<2x32xf32>
      %c0_19 = arith.constant 0 : index
      %c0_20 = arith.constant 0 : index
      %19 = vector.load %arg5[%c0_19, %c0_20] : memref<32x32xf32, #tpu.memory_space<vmem>>, vector<32x32xf32>
      %cst_21 = arith.constant dense<0.000000e+00> : vector<2x32xf32>
      %20 = tpu.matmul %18, %19, %cst_21 {dimension_numbers = #tpu.dot_dimension_numbers<[1], [0], [0], [1], [0, 0, 1, 1], [], []>} : vector<2x32xf32>, vector<32x32xf32>, vector<2x32xf32> -> vector<2x32xf32>
      %c0_22 = arith.constant 0 : index
      %c0_23 = arith.constant 0 : index
      %21 = vector.load %arg6[%c0_22, %c0_23] : memref<1x32xf32, #tpu.memory_space<vmem>>, vector<1x32xf32>
      %22 = vector.broadcast %21 : vector<1x32xf32> to vector<2x32xf32>
      %23 = arith.addf %20, %22 : vector<2x32xf32>
      %c0_24 = arith.constant 0 : index
      %c0_25 = arith.constant 0 : index
      %24 = vector.load %arg8[%c0_24, %c0_25] : memref<2x32xf32, #tpu.memory_space<vmem>>, vector<2x32xf32>
      tpu.vector_store %arg8[%c0_24, %c0_25], %23 {strides = array<i32>} : memref<2x32xf32, #tpu.memory_space<vmem>>, vector<2x32xf32>,
    } else {
    }
    return
  }
  func.func @transform_0(%arg0: i32, %arg1: i32) -> (i32, i32, i32) {
    %c0_i32 = arith.constant 0 : i32
    %c0_i32_0 = arith.constant 0 : i32
    return %arg0, %arg1, %c0_i32 : i32, i32, i32
  }
  func.func @transform_1(%arg0: i32, %arg1: i32) -> (i32, i32, i32) {
    %c0_i32 = arith.constant 0 : i32
    %c0_i32_0 = arith.constant 0 : i32
    return %arg0, %arg1, %c0_i32 : i32, i32, i32
  }
  func.func @transform_2(%arg0: i32, %arg1: i32) -> (i32, i32) {
    %c0_i32 = arith.constant 0 : i32
    %c0_i32_0 = arith.constant 0 : i32
    %c0_i32_1 = arith.constant 0 : i32
    return %c0_i32, %c0_i32_0 : i32, i32
  }
  func.func @transform_3(%arg0: i32, %arg1: i32) -> (i32, i32) {
    %c0_i32 = arith.constant 0 : i32
    %c0_i32_0 = arith.constant 0 : i32
    %c0_i32_1 = arith.constant 0 : i32
    return %c0_i32, %c0_i32_0 : i32, i32
  }
  func.func @transform_4(%arg0: i32, %arg1: i32) -> (i32, i32) {
    %c0_i32 = arith.constant 0 : i32
    %c0_i32_0 = arith.constant 0 : i32
    %c0_i32_1 = arith.constant 0 : i32
    return %c0_i32, %c0_i32_0 : i32, i32
  }
  func.func @transform_5(%arg0: i32, %arg1: i32) -> (i32, i32) {
    %c0_i32 = arith.constant 0 : i32
    %c0_i32_0 = arith.constant 0 : i32
    return %arg0, %c0_i32 : i32, i32
  }
  func.func @transform_6(%arg0: i32, %arg1: i32) -> (i32, i32) {
    %c0_i32 = arith.constant 0 : i32
    %c0_i32_0 = arith.constant 0 : i32
    return %arg0, %c0_i32 : i32, i32
  }
}

</mosaic_0001>

<bundles_post_ra>
// kernel: tpu_custom_call.1
= control target key start
LH: loop header
LB: loop body
LE: loop exit
PB: predicated region body
PF: predicated region fallthrough
CT: control target
= control target key end

     0   :  { %12 = vsyncpa [#allocation4], 0  ;;  %s566_s0 = inlined_call_operand.vmem [shape: f32[2,8,32], index: 0, kind: input, shape index: {}]   ;;  %s567_s1 = inlined_call_operand.vmem [shape: f32[2,8,1], index: 1, kind: input, shape index: {}]   ;;  %s568_s2 = inlined_call_operand.hbm [shape: f32[32,32], index: 2, kind: input, shape index: {}]   ;;  %s569_s3 = inlined_call_operand.hbm [shape: f32[32,32], index: 3, kind: input, shape index: {}]   ;;  %s570_s4 = inlined_call_operand.vmem [shape: f32[1,32], index: 4, kind: input, shape index: {}]   ;;  %s571_s5 = inlined_call_operand.hbm [shape: f32[2,32], index: 5, kind: output, shape index: {0}]   ;;  %s572_s6 = inlined_call_operand.hbm [shape: f32[2,32], index: 6, kind: output, shape index: {1}]  }
   0x1   :  { %13 = vsyncpa [#allocation7], 0 }
   0x2   :  { %14 = vsyncpa [#allocation5], 0 }
   0x3   :  { %15 = vsyncpa [#allocation10], 0  ;;  %s450_s21 = smov [#allocation3]   ;;  %s354_s25 = scalar_lea.hbm %s568_s2, 512 }
   0x4   :  { %s25_s22 = sshll.u32 %s450_s21, 4  ;;  %p355_p0 = scmp.ne.s32.totalorder %s568_s2, %s354_s25  ;;  %s26_s22 = int_to_ptr.vmem [resolvable:$true] %s25_s22 }
   0x5   :  { %p358_p1 = scmp.lt.u32.totalorder %s354_s25, %s568_s2 }
   0x7   :  { %p360_p2 = pnand %p358_p1, %p355_p0 }
   0x9   :  { %363 = shalt.err (!%p360_p2)
}
   0xa   :  { %s364_s30 = scalar_lea.vmem %s26_s22, 512  ;;  %p369_p4 = scmp.lt.s32.totalorder %s26_s22, %s26_s22 }
   0xb   :  { %p365_p3 = scmp.ne.s32.totalorder %s26_s22, %s364_s30  ;;  %p370_p5 = scmp.lt.s32.totalorder %s364_s30, %s364_s30 }
   0xd   :  { %p371_p6 = por %p370_p5, %p369_p4 }
   0xf   :  { %p372_p7 = pnand %p371_p6, %p365_p3 }
  0x11   :  { %375 = shalt.err (!%p372_p7)
}
  0x12   :  { %s451_s7 = smov 128   ;;  %s452_s8 = smov 8  }
  0x13   :  { %31 = dma.hbm_to_vmem [thread:$0]  %s568_s2, 512, %s26_s22, [#allocation4], %s451_s7, %s451_s7, %s452_s8  }
  0x14   :  { %s453_s11 = smov [#allocation6]   ;;  %s376_s15 = scalar_lea.hbm %s569_s3, 512 }
  0x15   :  { %s37_s12 = sshll.u32 %s453_s11, 4  ;;  %p377_p8 = scmp.ne.s32.totalorder %s569_s3, %s376_s15  ;;  %s38_s12 = int_to_ptr.vmem [resolvable:$true] %s37_s12 }
  0x16   :  { %p380_p9 = scmp.lt.u32.totalorder %s376_s15, %s569_s3 }
  0x18   :  { %p382_p10 = pnand %p380_p9, %p377_p8 }
  0x1a   :  { %385 = shalt.err (!%p382_p10)
}
  0x1b   :  { %s386_s20 = scalar_lea.vmem %s38_s12, 512  ;;  %p391_p12 = scmp.lt.s32.totalorder %s38_s12, %s38_s12 }
  0x1c   :  { %p387_p11 = scmp.ne.s32.totalorder %s38_s12, %s386_s20  ;;  %p392_p13 = scmp.lt.s32.totalorder %s386_s20, %s386_s20 }
  0x1e   :  { %p393_p0 = por %p392_p13, %p391_p12 }
  0x20   :  { %p394_p1 = pnand %p393_p0, %p387_p11 }
  0x22   :  { %397 = shalt.err (!%p394_p1)
}
  0x23   :  { %43 = dma.hbm_to_vmem [thread:$0]  %s569_s3, 512, %s38_s12, [#allocation7], %s451_s7, %s451_s7, %s452_s8  }
  0x24   :  { %442 = dma.done.wait [#allocation4], 512  }
  0x25   :  { %443 = vsyncadd [#allocation4], 4294966784 }
  0x26   :  { %444 = dma.done.wait [#allocation7], 512  }
  0x27   :  { %445 = vsyncadd [#allocation7], 4294966784  ;;  %v454_v0 = vmov 0   ;;  %v60_v1 = vld [vmem:[%s567_s1] sm:$0xff]  ;;  %v61_v2 = vld [vmem:[%s567_s1 + $0x8] sm:$0xff]  ;;  %vm56_vm0 = vcmask 254976  }
  0x28   :  { %353 = vset.pattern.permute.xlu0 %v454_v0  ;;  %v455_v3 = vmov 0.0   ;;  %v102_v4 = vld [vmem:[#allocation3] sm:$0xff]  ;;  %v103_v5 = vld [vmem:[#allocation3 + $0x8] sm:$0xff]  ;;  %v456_v7 = vmov 0.0|0.0   ;;  %v104_v10 = vld [vmem:[#allocation3 + $0x10] sm:$0xff]  ;;  %vm457_vm1 = vmmov 0  }
  0x29   :  { %65 = vperm.xlu0 %353, %v60_v1   ;;  %57 = vst.msk [vmem:[#allocation2] sm:$0x3] %vm56_vm0, %v455_v3  ;;  %v181_v6 = vld [vmem:[#allocation6] sm:$0xff]  ;;  %331 = vmatprep.subr.bf16.mxu0 %v456_v7  ;;  %v332_v8 = vpack.c.bf16 %v103_v5, %v102_v4  ;;  %v182_v9 = vld [vmem:[#allocation6 + $0x8] sm:$0xff]  ;;  %v105_v11 = vld [vmem:[#allocation3 + $0x18] sm:$0xff]  ;;  %vm75_vm2 = vcmask 261120  }
  0x2a   :  { %337 = vmatprep.subr.bf16.mxu1 %v456_v7  ;;  %v338_v12 = vpack.c.bf16 %v182_v9, %v181_v6  ;;  %v335_v13 = vpack.c.bf16 %v105_v11, %v104_v10  ;;  %v183_v14 = vld [vmem:[#allocation6 + $0x10] sm:$0xff]  ;;  %v184_v15 = vld [vmem:[#allocation6 + $0x18] sm:$0xff]  ;;  %317 = vmatprep.mubr.msk.f32.mxu0 %vm457_vm1, %v455_v3  ;;  %v59_v20 = vld [vmem:[%s566_s0 + $0x8] sm:$0xff]  ;;  %vm92_vm3 = vcmask 1041409   ;;  %s459_s7 = smov [#allocation9]  }
  0x2b   :  { %333 = vmatpush3.bf16.msra.mxu0 %v332_v8  ;;  %v341_v16 = vpack.c.bf16 %v184_v15, %v183_v14  ;;  %328 = vmatprep.mubr.msk.f32.mxu1 %vm457_vm1, %v455_v3  ;;  %v58_v17 = vld [vmem:[%s566_s0] sm:$0xff]  ;;  %s458_s0 = smov [#allocation8]   ;;  %s282_s8 = sshll.u32 %s459_s7, 4  ;;  %s283_s8 = int_to_ptr.vmem [resolvable:$true] %s282_s8 }
  0x2c   :  { %339 = vmatpush3.bf16.msra.mxu1 %v338_v12  ;;  %334 = vmatprep.subr.bf16.mxu0 %v456_v7  ;;  %s272_s28 = sshll.u32 %s458_s0, 4  ;;  %v297_v43 = vld [vmem:[%s570_s4] ss:$0 sm:$0xff]  ;;  %s273_s28 = int_to_ptr.vmem [resolvable:$true] %s272_s28 }
  0x2d   :  { %70 = vperm.xlu0 %353, %v61_v2   ;;  %340 = vmatprep.subr.bf16.mxu1 %v456_v7  ;;  %s398_s9 = scalar_lea.vmem %s273_s28, 32  ;;  %p403_p3 = scmp.lt.s32.totalorder %s273_s28, %s273_s28 }
  0x2e   :  { %p399_p2 = scmp.ne.s32.totalorder %s273_s28, %s398_s9  ;;  %p404_p4 = scmp.lt.s32.totalorder %s398_s9, %s398_s9 }
  0x2f   :  { %336 = vmatpush3.bf16.msra.mxu0 %v335_v13 }
  0x30   :  { %342 = vmatpush3.bf16.msra.mxu1 %v341_v16  ;;  %v62_v37 = vld [vmem:[#allocation2] sm:$0x3]  ;;  %p405_p5 = por %p404_p4, %p403_p3 }
  0x32   :  { %p406_p6 = pnand %p405_p5, %p399_p2 }
  0xa8   :  { %v66_v18 = vpop.permute.xlu0 %65 }
  0xa9   :  { %v73_v19 = vmul.f32 %v66_v18, %v58_v17 }
  0xab   :  { %v76_v21 = vsel %vm75_vm2, %v73_v19, 0.0 }
  0xac   :  { %v77_v22 = vrot.slane %v76_v21, 4  ;;  %v71_v23 = vpop.permute.xlu0 %70 }
  0xad   :  { %v74_v24 = vmul.f32 %v71_v23, %v59_v20 }
  0xae   :  { %v78_v25 = vadd.f32 %v77_v22, %v76_v21 }
  0xaf   :  { %v83_v26 = vsel %vm75_vm2, %v74_v24, 0.0 }
  0xb0   :  { %v79_v27 = vrot.slane %v78_v25, 2  ;;  %v84_v28 = vrot.slane %v83_v26, 4 }
  0xb2   :  { %v80_v29 = vadd.f32 %v79_v27, %v78_v25  ;;  %v85_v30 = vadd.f32 %v84_v28, %v83_v26 }
  0xb4   :  { %v86_v31 = vrot.slane %v85_v30, 2  ;;  %v81_v32 = vrot.slane %v80_v29, 1 }
  0xb6   :  { %v87_v33 = vadd.f32 %v86_v31, %v85_v30  ;;  %v82_v35 = vadd.f32 %v81_v32, %v80_v29 }
  0xb8   :  { %v88_v34 = vrot.slane %v87_v33, 1 }
  0xba   :  { %v89_v36 = vadd.f32 %v88_v34, %v87_v33 }
  0xbc   :  { %v93_v38 = vsel %vm92_vm3, %v89_v36, %v82_v35 }
  0xbd   :  { %v95_v39 = vadd.f32 %v93_v38, %v62_v37 }
  0xbf   :  { %97 = vst.msk [vmem:[#allocation2] sm:$0x3] %vm56_vm0, %v95_v39 }
  0xc6   :  { %v101_v40 = vld [vmem:[#allocation2] sm:$0x3] }
  0xc7   :  { %318 = vmatmul.mubr.msk.f32.vlgmr.msra.gmra.mrb[0].mxu0 %vm75_vm2, %v101_v40  ;;  %v180_v41 = vmul.f32 %v101_v40, %v101_v40 }
  0xc9   :  { %329 = vmatmul.mubr.msk.f32.vlgmr.msra.gmra.mrb[0].mxu1 %vm75_vm2, %v180_v41 }
 0x19a   :  { %v175_v42 = vpop.f32.mrb[0].mxu0 }
 0x19b   :  { %179 = vst.msk [vmem:[#allocation8] sm:$0x3] %vm56_vm0, %v175_v42  ;;  %v319_v44 = vpop.f32.mrb[1].mxu0 }
 0x19c   :  { %v261_v45 = vpop.f32.mrb[0].mxu1 }
 0x19d   :  { %409 = shalt.err (!%p406_p6)
}
 0x19e   :  { %s410_s12 = scalar_lea.hbm %s571_s5, 32 }
 0x19f   :  { %p411_p7 = scmp.ne.s32.totalorder %s571_s5, %s410_s12  ;;  %p414_p8 = scmp.lt.u32.totalorder %s410_s12, %s571_s5 }
 0x1a1   :  { %p416_p9 = pnand %p414_p8, %p411_p7 }
 0x1a3   :  { %419 = shalt.err (!%p416_p9)
}
 0x1a4   :  { %275 = dma.vmem_to_hbm [thread:$0]  %s273_s28, 32, %s571_s5, [#allocation5]   ;;  %v262_v46 = vadd.f32 %v297_v43, %v261_v45  ;;  %v330_v47 = vpop.f32.mrb[1].mxu1 }
 0x1a5   :  { %s420_s18 = scalar_lea.vmem %s283_s8, 32  ;;  %p425_p11 = scmp.lt.s32.totalorder %s283_s8, %s283_s8 }
 0x1a6   :  { %265 = vst.msk [vmem:[#allocation9] sm:$0x3] %vm56_vm0, %v262_v46  ;;  %p421_p10 = scmp.ne.s32.totalorder %s283_s8, %s420_s18  ;;  %p426_p12 = scmp.lt.s32.totalorder %s420_s18, %s420_s18 }
 0x1a8   :  { %p427_p13 = por %p426_p12, %p425_p11 }
 0x1aa   :  { %p428_p0 = pnand %p427_p13, %p421_p10 }
 0x1ac   :  { %431 = shalt.err (!%p428_p0)
}
 0x1ad   :  { %s432_s2 = scalar_lea.hbm %s572_s6, 32 }
 0x1ae   :  { %p433_p1 = scmp.ne.s32.totalorder %s572_s6, %s432_s2  ;;  %p436_p2 = scmp.lt.u32.totalorder %s432_s2, %s572_s6 }
 0x1b0   :  { %p438_p3 = pnand %p436_p2, %p433_p1 }
 0x1b2   :  { %441 = shalt.err (!%p438_p3)
}
 0x1b3   :  { %285 = dma.vmem_to_hbm [thread:$0]  %s283_s8, 32, %s572_s6, [#allocation10]  }
 0x1b4   :  { %446 = dma.done.wait [#allocation5], 32  }
 0x1b5   :  { %447 = vsyncadd [#allocation5], 4294967264 }
 0x1b6   :  { %448 = dma.done.wait [#allocation10], 32  }
 0x1b7   :  { %449 = vsyncadd [#allocation10], 4294967264 }
 0x1b8   :  { %292 = vsyncpa [#allocation4], 1 }
 0x1b9   :  { %293 = vsyncpa [#allocation7], 1 }
 0x1ba   :  { %294 = vsyncpa [#allocation5], 1 }
 0x1bb   :  { %295 = vsyncpa [#allocation10], 1 }

// kernel: tpu_custom_call.1
= control target key start
LH: loop header
LB: loop body
LE: loop exit
PB: predicated region body
PF: predicated region fallthrough
CT: control target
= control target key end

     0   :  { %12 = vsyncpa [#allocation4], 0  ;;  %s566_s0 = inlined_call_operand.vmem [shape: f32[2,8,32], index: 0, kind: input, shape index: {}]   ;;  %s567_s1 = inlined_call_operand.vmem [shape: f32[2,8,1], index: 1, kind: input, shape index: {}]   ;;  %s568_s2 = inlined_call_operand.hbm [shape: f32[32,32], index: 2, kind: input, shape index: {}]   ;;  %s569_s3 = inlined_call_operand.hbm [shape: f32[32,32], index: 3, kind: input, shape index: {}]   ;;  %s570_s4 = inlined_call_operand.vmem [shape: f32[1,32], index: 4, kind: input, shape index: {}]   ;;  %s571_s5 = inlined_call_operand.hbm [shape: f32[2,32], index: 5, kind: output, shape index: {0}]   ;;  %s572_s6 = inlined_call_operand.hbm [shape: f32[2,32], index: 6, kind: output, shape index: {1}]  }
   0x1   :  { %13 = vsyncpa [#allocation7], 0 }
   0x2   :  { %14 = vsyncpa [#allocation5], 0 }
   0x3   :  { %15 = vsyncpa [#allocation10], 0  ;;  %s450_s21 = smov [#allocation3]   ;;  %s354_s25 = scalar_lea.hbm %s568_s2, 512 }
   0x4   :  { %s25_s22 = sshll.u32 %s450_s21, 4  ;;  %p355_p0 = scmp.ne.s32.totalorder %s568_s2, %s354_s25  ;;  %s26_s22 = int_to_ptr.vmem [resolvable:$true] %s25_s22 }
   0x5   :  { %p358_p1 = scmp.lt.u32.totalorder %s354_s25, %s568_s2 }
   0x7   :  { %p360_p2 = pnand %p358_p1, %p355_p0 }
   0x9   :  { %363 = shalt.err (!%p360_p2)
}
   0xa   :  { %s364_s30 = scalar_lea.vmem %s26_s22, 512  ;;  %p369_p4 = scmp.lt.s32.totalorder %s26_s22, %s26_s22 }
   0xb   :  { %p365_p3 = scmp.ne.s32.totalorder %s26_s22, %s364_s30  ;;  %p370_p5 = scmp.lt.s32.totalorder %s364_s30, %s364_s30 }
   0xd   :  { %p371_p6 = por %p370_p5, %p369_p4 }
   0xf   :  { %p372_p7 = pnand %p371_p6, %p365_p3 }
  0x11   :  { %375 = shalt.err (!%p372_p7)
}
  0x12   :  { %s451_s7 = smov 128   ;;  %s452_s8 = smov 8  }
  0x13   :  { %31 = dma.hbm_to_vmem [thread:$0]  %s568_s2, 512, %s26_s22, [#allocation4], %s451_s7, %s451_s7, %s452_s8  }
  0x14   :  { %s453_s11 = smov [#allocation6]   ;;  %s376_s15 = scalar_lea.hbm %s569_s3, 512 }
  0x15   :  { %s37_s12 = sshll.u32 %s453_s11, 4  ;;  %p377_p8 = scmp.ne.s32.totalorder %s569_s3, %s376_s15  ;;  %s38_s12 = int_to_ptr.vmem [resolvable:$true] %s37_s12 }
  0x16   :  { %p380_p9 = scmp.lt.u32.totalorder %s376_s15, %s569_s3 }
  0x18   :  { %p382_p10 = pnand %p380_p9, %p377_p8 }
  0x1a   :  { %385 = shalt.err (!%p382_p10)
}
  0x1b   :  { %s386_s20 = scalar_lea.vmem %s38_s12, 512  ;;  %p391_p12 = scmp.lt.s32.totalorder %s38_s12, %s38_s12 }
  0x1c   :  { %p387_p11 = scmp.ne.s32.totalorder %s38_s12, %s386_s20  ;;  %p392_p13 = scmp.lt.s32.totalorder %s386_s20, %s386_s20 }
  0x1e   :  { %p393_p0 = por %p392_p13, %p391_p12 }
  0x20   :  { %p394_p1 = pnand %p393_p0, %p387_p11 }
  0x22   :  { %397 = shalt.err (!%p394_p1)
}
  0x23   :  { %43 = dma.hbm_to_vmem [thread:$0]  %s569_s3, 512, %s38_s12, [#allocation7], %s451_s7, %s451_s7, %s452_s8  }
  0x24   :  { %442 = dma.done.wait [#allocation4], 512  }
  0x25   :  { %443 = vsyncadd [#allocation4], 4294966784 }
  0x26   :  { %444 = dma.done.wait [#allocation7], 512  }
  0x27   :  { %445 = vsyncadd [#allocation7], 4294966784  ;;  %v454_v0 = vmov 0   ;;  %v60_v1 = vld [vmem:[%s567_s1] sm:$0xff]  ;;  %v61_v2 = vld [vmem:[%s567_s1 + $0x8] sm:$0xff]  ;;  %vm56_vm0 = vcmask 254976  }
  0x28   :  { %353 = vset.pattern.permute.xlu0 %v454_v0  ;;  %v455_v3 = vmov 0.0   ;;  %v102_v4 = vld [vmem:[#allocation3] sm:$0xff]  ;;  %v103_v5 = vld [vmem:[#allocation3 + $0x8] sm:$0xff]  ;;  %v456_v7 = vmov 0.0|0.0   ;;  %v104_v10 = vld [vmem:[#allocation3 + $0x10] sm:$0xff]  ;;  %vm457_vm1 = vmmov 0  }
  0x29   :  { %65 = vperm.xlu0 %353, %v60_v1   ;;  %57 = vst.msk [vmem:[#allocation2] sm:$0x3] %vm56_vm0, %v455_v3  ;;  %v181_v6 = vld [vmem:[#allocation6] sm:$0xff]  ;;  %331 = vmatprep.subr.bf16.mxu0 %v456_v7  ;;  %v332_v8 = vpack.c.bf16 %v103_v5, %v102_v4  ;;  %v182_v9 = vld [vmem:[#allocation6 + $0x8] sm:$0xff]  ;;  %v105_v11 = vld [vmem:[#allocation3 + $0x18] sm:$0xff]  ;;  %vm75_vm2 = vcmask 261120  }
  0x2a   :  { %337 = vmatprep.subr.bf16.mxu1 %v456_v7  ;;  %v338_v12 = vpack.c.bf16 %v182_v9, %v181_v6  ;;  %v335_v13 = vpack.c.bf16 %v105_v11, %v104_v10  ;;  %v183_v14 = vld [vmem:[#allocation6 + $0x10] sm:$0xff]  ;;  %v184_v15 = vld [vmem:[#allocation6 + $0x18] sm:$0xff]  ;;  %317 = vmatprep.mubr.msk.f32.mxu0 %vm457_vm1, %v455_v3  ;;  %v59_v20 = vld [vmem:[%s566_s0 + $0x8] sm:$0xff]  ;;  %vm92_vm3 = vcmask 1041409   ;;  %s459_s7 = smov [#allocation9]  }
  0x2b   :  { %333 = vmatpush3.bf16.msra.mxu0 %v332_v8  ;;  %v341_v16 = vpack.c.bf16 %v184_v15, %v183_v14  ;;  %328 = vmatprep.mubr.msk.f32.mxu1 %vm457_vm1, %v455_v3  ;;  %v58_v17 = vld [vmem:[%s566_s0] sm:$0xff]  ;;  %s458_s0 = smov [#allocation8]   ;;  %s282_s8 = sshll.u32 %s459_s7, 4  ;;  %s283_s8 = int_to_ptr.vmem [resolvable:$true] %s282_s8 }
  0x2c   :  { %339 = vmatpush3.bf16.msra.mxu1 %v338_v12  ;;  %334 = vmatprep.subr.bf16.mxu0 %v456_v7  ;;  %s272_s28 = sshll.u32 %s458_s0, 4  ;;  %v297_v43 = vld [vmem:[%s570_s4] ss:$0 sm:$0xff]  ;;  %s273_s28 = int_to_ptr.vmem [resolvable:$true] %s272_s28 }
  0x2d   :  { %70 = vperm.xlu0 %353, %v61_v2   ;;  %340 = vmatprep.subr.bf16.mxu1 %v456_v7  ;;  %s398_s9 = scalar_lea.vmem %s273_s28, 32  ;;  %p403_p3 = scmp.lt.s32.totalorder %s273_s28, %s273_s28 }
  0x2e   :  { %p399_p2 = scmp.ne.s32.totalorder %s273_s28, %s398_s9  ;;  %p404_p4 = scmp.lt.s32.totalorder %s398_s9, %s398_s9 }
  0x2f   :  { %336 = vmatpush3.bf16.msra.mxu0 %v335_v13 }
  0x30   :  { %342 = vmatpush3.bf16.msra.mxu1 %v341_v16  ;;  %v62_v37 = vld [vmem:[#allocation2] sm:$0x3]  ;;  %p405_p5 = por %p404_p4, %p403_p3 }
  0x32   :  { %p406_p6 = pnand %p405_p5, %p399_p2 }
  0xa8   :  { %v66_v18 = vpop.permute.xlu0 %65 }
  0xa9   :  { %v73_v19 = vmul.f32 %v66_v18, %v58_v17 }
  0xab   :  { %v76_v21 = vsel %vm75_vm2, %v73_v19, 0.0 }
  0xac   :  { %v77_v22 = vrot.slane %v76_v21, 4  ;;  %v71_v23 = vpop.permute.xlu0 %70 }
  0xad   :  { %v74_v24 = vmul.f32 %v71_v23, %v59_v20 }
  0xae   :  { %v78_v25 = vadd.f32 %v77_v22, %v76_v21 }
  0xaf   :  { %v83_v26 = vsel %vm75_vm2, %v74_v24, 0.0 }
  0xb0   :  { %v79_v27 = vrot.slane %v78_v25, 2  ;;  %v84_v28 = vrot.slane %v83_v26, 4 }
  0xb2   :  { %v80_v29 = vadd.f32 %v79_v27, %v78_v25  ;;  %v85_v30 = vadd.f32 %v84_v28, %v83_v26 }
  0xb4   :  { %v86_v31 = vrot.slane %v85_v30, 2  ;;  %v81_v32 = vrot.slane %v80_v29, 1 }
  0xb6   :  { %v87_v33 = vadd.f32 %v86_v31, %v85_v30  ;;  %v82_v35 = vadd.f32 %v81_v32, %v80_v29 }
  0xb8   :  { %v88_v34 = vrot.slane %v87_v33, 1 }
  0xba   :  { %v89_v36 = vadd.f32 %v88_v34, %v87_v33 }
  0xbc   :  { %v93_v38 = vsel %vm92_vm3, %v89_v36, %v82_v35 }
  0xbd   :  { %v95_v39 = vadd.f32 %v93_v38, %v62_v37 }
  0xbf   :  { %97 = vst.msk [vmem:[#allocation2] sm:$0x3] %vm56_vm0, %v95_v39 }
  0xc6   :  { %v101_v40 = vld [vmem:[#allocation2] sm:$0x3] }
  0xc7   :  { %318 = vmatmul.mubr.msk.f32.vlgmr.msra.gmra.mrb[0].mxu0 %vm75_vm2, %v101_v40  ;;  %v180_v41 = vmul.f32 %v101_v40, %v101_v40 }
  0xc9   :  { %329 = vmatmul.mubr.msk.f32.vlgmr.msra.gmra.mrb[0].mxu1 %vm75_vm2, %v180_v41 }
 0x19a   :  { %v175_v42 = vpop.f32.mrb[0].mxu0 }
 0x19b   :  { %179 = vst.msk [vmem:[#allocation8] sm:$0x3] %vm56_vm0, %v175_v42  ;;  %v319_v44 = vpop.f32.mrb[1].mxu0 }
 0x19c   :  { %v261_v45 = vpop.f32.mrb[0].mxu1 }
 0x19d   :  { %409 = shalt.err (!%p406_p6)
}
 0x19e   :  { %s410_s12 = scalar_lea.hbm %s571_s5, 32 }
 0x19f   :  { %p411_p7 = scmp.ne.s32.totalorder %s571_s5, %s410_s12  ;;  %p414_p8 = scmp.lt.u32.totalorder %s410_s12, %s571_s5 }
 0x1a1   :  { %p416_p9 = pnand %p414_p8, %p411_p7 }
 0x1a3   :  { %419 = shalt.err (!%p416_p9)
}
 0x1a4   :  { %275 = dma.vmem_to_hbm [thread:$0]  %s273_s28, 32, %s571_s5, [#allocation5]   ;;  %v262_v46 = vadd.f32 %v297_v43, %v261_v45  ;;  %v330_v47 = vpop.f32.mrb[1].mxu1 }
 0x1a5   :  { %s420_s18 = scalar_lea.vmem %s283_s8, 32  ;;  %p425_p11 = scmp.lt.s32.totalorder %s283_s8, %s283_s8 }
 0x1a6   :  { %265 = vst.msk [vmem:[#allocation9] sm:$0x3] %vm56_vm0, %v262_v46  ;;  %p421_p10 = scmp.ne.s32.totalorder %s283_s8, %s420_s18  ;;  %p426_p12 = scmp.lt.s32.totalorder %s420_s18, %s420_s18 }
 0x1a8   :  { %p427_p13 = por %p426_p12, %p425_p11 }
 0x1aa   :  { %p428_p0 = pnand %p427_p13, %p421_p10 }
 0x1ac   :  { %431 = shalt.err (!%p428_p0)
}
 0x1ad   :  { %s432_s2 = scalar_lea.hbm %s572_s6, 32 }
 0x1ae   :  { %p433_p1 = scmp.ne.s32.totalorder %s572_s6, %s432_s2  ;;  %p436_p2 = scmp.lt.u32.totalorder %s432_s2, %s572_s6 }
 0x1b0   :  { %p438_p3 = pnand %p436_p2, %p433_p1 }
 0x1b2   :  { %441 = shalt.err (!%p438_p3)
}
 0x1b3   :  { %285 = dma.vmem_to_hbm [thread:$0]  %s283_s8, 32, %s572_s6, [#allocation10]  }
 0x1b4   :  { %446 = dma.done.wait [#allocation5], 32  }
 0x1b5   :  { %447 = vsyncadd [#allocation5], 4294967264 }
 0x1b6   :  { %448 = dma.done.wait [#allocation10], 32  }
 0x1b7   :  { %449 = vsyncadd [#allocation10], 4294967264 }
 0x1b8   :  { %292 = vsyncpa [#allocation4], 1 }
 0x1b9   :  { %293 = vsyncpa [#allocation7], 1 }
 0x1ba   :  { %294 = vsyncpa [#allocation5], 1 }
 0x1bb   :  { %295 = vsyncpa [#allocation10], 1 }

</bundles_post_ra>
